<compile_context>
chip_gen: v7x
topology: tpu7x:2x2x1
jax: 0.10.0
libtpu: 0.0.40
codegen_flags: <defaults>
</compile_context>

<pallas_src>
import math

import jax
import jax.numpy as jnp
from jax.experimental import pallas as pl
from jax.experimental.pallas import tpu as pltpu


_LANE = 128     # lane width: last dim of every tile should be a multiple of this
_SUBLANE = 8    # f32 sublane granularity: batch tile must be a multiple of this


def _round_up(n: int, m: int) -> int:
    return ((n + m - 1) // m) * m


def _make_mlp_kernel(num_layers: int, matmul_dtype):
    """Kernel closure. Ref order: (x, w0, b0, w1, b1, ..., out).

    Activations are [TB, features] (features on lanes). Weights are stored
    [in, out] so each layer is `h @ W + b`. Biases are [1, out].
    """

    def kernel(*refs):
        x_ref = refs[0]
        out_ref = refs[-1]
        wb = refs[1:-1]

        # Elementwise + transcendental work stays in f32 (v5e VPU/EUP are
        # f32-only); only the MXU operands take `matmul_dtype`.
        h = x_ref[...].astype(jnp.float32)
        for i in range(num_layers):
            w = wb[2 * i][...]                                    # [in_i, out_i]
            b = wb[2 * i + 1][...].astype(jnp.float32)            # [1, out_i]
            h = jnp.dot(h.astype(matmul_dtype), w.astype(matmul_dtype),
                        preferred_element_type=jnp.float32) + b   # MXU + VPU
            if i < num_layers - 1:
                h = jnp.tanh(h)                                   # EUP
        out_ref[...] = h.astype(out_ref.dtype)

    return kernel


def mlp_forward(x, weights, biases, *, batch_tile=None, matmul_dtype=jnp.float32):
    """Fused MLP forward.

    x:       [batch, sizes[0]]
    weights: list of [sizes[i], sizes[i+1]]   (in-major: transpose of torch Linear.weight)
    biases:  list of [sizes[i+1]]
    """
    num_layers = len(weights)
    assert len(biases) == num_layers
    batch, in_dim = x.shape
    out_dim = weights[-1].shape[1]

    # ---- Lane-align every feature dimension to a multiple of 128. ----------
    dims = [in_dim] + [w.shape[1] for w in weights]
    dims_p = [_round_up(d, _LANE) for d in dims]

    # ---- Batch tile: multiple of 8 (f32 sublane); grid over padded batch. ---
    if batch_tile is None:
        batch_tile = min(256, _round_up(batch, _SUBLANE))
    batch_tile = _round_up(batch_tile, _SUBLANE)
    batch_p = _round_up(batch, batch_tile)
    grid = (batch_p // batch_tile,)

    # ---- Pad inputs / params (zero padding is exact for this MLP). ---------
    x_p = jnp.pad(x, ((0, batch_p - batch), (0, dims_p[0] - dims[0])))
    args = [x_p]
    in_specs = [pl.BlockSpec((batch_tile, dims_p[0]), lambda i: (i, 0))]
    for li in range(num_layers):
        di, do = dims[li], dims[li + 1]
        dip, dop = dims_p[li], dims_p[li + 1]
        w_p = jnp.pad(weights[li], ((0, dip - di), (0, dop - do))).astype(matmul_dtype)
        b_p = jnp.pad(biases[li], (0, dop - do)).reshape(1, dop).astype(jnp.float32)
        args += [w_p, b_p]
        # Constant index_map -> weights/biases stay VMEM-resident across the
        # whole batch grid (DMA'd exactly once per pallas_call).
        in_specs += [
            pl.BlockSpec((dip, dop), lambda i: (0, 0)),
            pl.BlockSpec((1, dop), lambda i: (0, 0)),
        ]

    out_specs = pl.BlockSpec((batch_tile, dims_p[-1]), lambda i: (i, 0))
    out_shape = jax.ShapeDtypeStruct((batch_p, dims_p[-1]), x.dtype)

    # ---- Explicit VMEM budget (resident weights + double-buffered tiles). --
    mm_itemsize = jnp.dtype(matmul_dtype).itemsize
    x_itemsize = jnp.dtype(x.dtype).itemsize
    weight_bytes = sum(dims_p[i] * dims_p[i + 1] * mm_itemsize
                       for i in range(num_layers))
    bias_bytes = sum(dims_p[i + 1] * 4 for i in range(num_layers))
    io_bytes = 2 * batch_tile * (dims_p[0] + dims_p[-1]) * x_itemsize  # double-buffered x/out
    act_bytes = 4 * batch_tile * max(dims_p) * 4                       # f32 intermediates
    vmem_bytes = int(1.5 * (weight_bytes + bias_bytes + io_bytes + act_bytes)) + (2 << 20)
    vmem_bytes = max(vmem_bytes, 8 << 20)
    vmem_bytes = min(vmem_bytes, 64 << 20)   # never over-ask v7x's 64 MiB/TC

    # ---- Advisory cost estimate for the XLA scheduler. ----------------------
    flops = 2 * batch_p * sum(dims_p[i] * dims_p[i + 1] for i in range(num_layers))
    transcendentals = batch_p * sum(dims_p[1:-1])
    bytes_accessed = (x_p.size * x_itemsize + weight_bytes + bias_bytes
                      + batch_p * dims_p[-1] * x_itemsize)
    cost = pl.CostEstimate(flops=flops, transcendentals=transcendentals,
                           bytes_accessed=bytes_accessed)

    out_p = pl.pallas_call(
        _make_mlp_kernel(num_layers, matmul_dtype),
        out_shape=out_shape,
        grid=grid,
        in_specs=in_specs,
        out_specs=out_specs,
        compiler_params=pltpu.CompilerParams(
            dimension_semantics=("parallel",),   # batch tiles split across v7x's 2 TCs
            vmem_limit_bytes=vmem_bytes,
        ),
        cost_estimate=cost,
    )(*args)

    # Slice off the batch / lane padding.
    return out_p[:batch, :out_dim]


def init_mlp_params(key, sizes):
    """Deterministic PyTorch-style Linear init: U(-1/sqrt(fan_in), +1/sqrt(fan_in))."""
    weights, biases = [], []
    for i in range(len(sizes) - 1):
        fan_in, fan_out = sizes[i], sizes[i + 1]
        key, kw, kb = jax.random.split(key, 3)
        bound = 1.0 / math.sqrt(fan_in)
        # Stored as [in, out] (transpose of torch.nn.Linear.weight).
        w = jax.random.uniform(kw, (fan_in, fan_out), jnp.float32, -bound, bound)
        b = jax.random.uniform(kb, (fan_out,), jnp.float32, -bound, bound)
        weights.append(w)
        biases.append(b)
    return weights, biases


def mlp_reference(x, weights, biases):
    """Pure-JAX reference matching CustomFunctionMLP.forward semantics."""
    h = x
    for w, b in zip(weights[:-1], biases[:-1]):
        h = jnp.tanh(h @ w + b)
    return h @ weights[-1] + biases[-1]


if __name__ == "__main__":
    sizes = [16, 32, 32, 8]   # [input_dim, hidden1, hidden2, output_dim]
    batch = 24

    key = jax.random.PRNGKey(0)
    key, kx = jax.random.split(key)
    x = jax.random.normal(kx, (batch, sizes[0]), jnp.float32)

    weights, biases = init_mlp_params(key, sizes)

    # batch_tile=8 -> grid=(3,): exercises the batch pipeline with
    # VMEM-resident weights (constant index_map) while staying tiny.
    out = mlp_forward(x, weights, biases, batch_tile=8)
    out = jax.block_until_ready(out)

    ref = mlp_reference(x, weights, biases)
    assert out.shape == (batch, sizes[-1])
    assert jnp.allclose(out, ref, atol=1e-5, rtol=1e-5), "mismatch vs reference"

    print("KERNEL_OK")
</pallas_src>

<mosaic_0001>
module attributes {stable_mosaic.version = 11 : i64} {
  func.func @kernel(%arg0: i32, %arg1: memref<8x128xf32, #tpu.memory_space<vmem>>, %arg2: memref<128x128xf32, #tpu.memory_space<vmem>>, %arg3: memref<1x128xf32, #tpu.memory_space<vmem>>, %arg4: memref<128x128xf32, #tpu.memory_space<vmem>>, %arg5: memref<1x128xf32, #tpu.memory_space<vmem>>, %arg6: memref<128x128xf32, #tpu.memory_space<vmem>>, %arg7: memref<1x128xf32, #tpu.memory_space<vmem>>, %arg8: memref<8x128xf32, #tpu.memory_space<vmem>>) attributes {dimension_semantics = [#tpu.dimension_semantics<parallel>], iteration_bounds = array<i64: 3>, scalar_prefetch = 0 : i64, scratch_operands = 0 : i64, tpu.core_type = #tpu.core_type<tc>, window_params = [{transform_indices = @transform_0, window_bounds = array<i64: 8, 128>}, {pipeline_mode = #tpu.pipeline_mode<synchronous>, transform_indices = @transform_1, window_bounds = array<i64: 128, 128>}, {pipeline_mode = #tpu.pipeline_mode<synchronous>, transform_indices = @transform_2, window_bounds = array<i64: 1, 128>}, {pipeline_mode = #tpu.pipeline_mode<synchronous>, transform_indices = @transform_3, window_bounds = array<i64: 128, 128>}, {pipeline_mode = #tpu.pipeline_mode<synchronous>, transform_indices = @transform_4, window_bounds = array<i64: 1, 128>}, {pipeline_mode = #tpu.pipeline_mode<synchronous>, transform_indices = @transform_5, window_bounds = array<i64: 128, 128>}, {pipeline_mode = #tpu.pipeline_mode<synchronous>, transform_indices = @transform_6, window_bounds = array<i64: 1, 128>}, {transform_indices = @transform_7, window_bounds = array<i64: 8, 128>}]} {
    %c0 = arith.constant 0 : index
    %c0_0 = arith.constant 0 : index
    %0 = vector.load %arg1[%c0, %c0_0] : memref<8x128xf32, #tpu.memory_space<vmem>>, vector<8x128xf32>
    %c0_1 = arith.constant 0 : index
    %c0_2 = arith.constant 0 : index
    %1 = vector.load %arg2[%c0_1, %c0_2] : memref<128x128xf32, #tpu.memory_space<vmem>>, vector<128x128xf32>
    %c0_3 = arith.constant 0 : index
    %c0_4 = arith.constant 0 : index
    %2 = vector.load %arg3[%c0_3, %c0_4] : memref<1x128xf32, #tpu.memory_space<vmem>>, vector<1x128xf32>
    %cst = arith.constant dense<0.000000e+00> : vector<8x128xf32>
    %3 = tpu.matmul %0, %1, %cst {dimension_numbers = #tpu.dot_dimension_numbers<[1], [0], [0], [1], [0, 0, 1, 1], [], []>} : vector<8x128xf32>, vector<128x128xf32>, vector<8x128xf32> -> vector<8x128xf32>
    %4 = vector.broadcast %2 : vector<1x128xf32> to vector<8x128xf32>
    %5 = arith.addf %3, %4 : vector<8x128xf32>
    %6 = math.tanh %5 : vector<8x128xf32>
    %c0_5 = arith.constant 0 : index
    %c0_6 = arith.constant 0 : index
    %7 = vector.load %arg4[%c0_5, %c0_6] : memref<128x128xf32, #tpu.memory_space<vmem>>, vector<128x128xf32>
    %c0_7 = arith.constant 0 : index
    %c0_8 = arith.constant 0 : index
    %8 = vector.load %arg5[%c0_7, %c0_8] : memref<1x128xf32, #tpu.memory_space<vmem>>, vector<1x128xf32>
    %cst_9 = arith.constant dense<0.000000e+00> : vector<8x128xf32>
    %9 = tpu.matmul %6, %7, %cst_9 {dimension_numbers = #tpu.dot_dimension_numbers<[1], [0], [0], [1], [0, 0, 1, 1], [], []>} : vector<8x128xf32>, vector<128x128xf32>, vector<8x128xf32> -> vector<8x128xf32>
    %10 = vector.broadcast %8 : vector<1x128xf32> to vector<8x128xf32>
    %11 = arith.addf %9, %10 : vector<8x128xf32>
    %12 = math.tanh %11 : vector<8x128xf32>
    %c0_10 = arith.constant 0 : index
    %c0_11 = arith.constant 0 : index
    %13 = vector.load %arg6[%c0_10, %c0_11] : memref<128x128xf32, #tpu.memory_space<vmem>>, vector<128x128xf32>
    %c0_12 = arith.constant 0 : index
    %c0_13 = arith.constant 0 : index
    %14 = vector.load %arg7[%c0_12, %c0_13] : memref<1x128xf32, #tpu.memory_space<vmem>>, vector<1x128xf32>
    %cst_14 = arith.constant dense<0.000000e+00> : vector<8x128xf32>
    %15 = tpu.matmul %12, %13, %cst_14 {dimension_numbers = #tpu.dot_dimension_numbers<[1], [0], [0], [1], [0, 0, 1, 1], [], []>} : vector<8x128xf32>, vector<128x128xf32>, vector<8x128xf32> -> vector<8x128xf32>
    %16 = vector.broadcast %14 : vector<1x128xf32> to vector<8x128xf32>
    %17 = arith.addf %15, %16 : vector<8x128xf32>
    %c0_15 = arith.constant 0 : index
    %c0_16 = arith.constant 0 : index
    %18 = vector.load %arg8[%c0_15, %c0_16] : memref<8x128xf32, #tpu.memory_space<vmem>>, vector<8x128xf32>
    tpu.vector_store %arg8[%c0_15, %c0_16], %17 {strides = array<i32>} : memref<8x128xf32, #tpu.memory_space<vmem>>, vector<8x128xf32>,
    return
  }
  func.func @transform_0(%arg0: i32) -> (i32, i32) {
    %c0_i32 = arith.constant 0 : i32
    %c0_i32_0 = arith.constant 0 : i32
    return %arg0, %c0_i32 : i32, i32
  }
  func.func @transform_1(%arg0: i32) -> (i32, i32) {
    %c0_i32 = arith.constant 0 : i32
    %c0_i32_0 = arith.constant 0 : i32
    %c0_i32_1 = arith.constant 0 : i32
    return %c0_i32, %c0_i32_0 : i32, i32
  }
  func.func @transform_2(%arg0: i32) -> (i32, i32) {
    %c0_i32 = arith.constant 0 : i32
    %c0_i32_0 = arith.constant 0 : i32
    %c0_i32_1 = arith.constant 0 : i32
    return %c0_i32, %c0_i32_0 : i32, i32
  }
  func.func @transform_3(%arg0: i32) -> (i32, i32) {
    %c0_i32 = arith.constant 0 : i32
    %c0_i32_0 = arith.constant 0 : i32
    %c0_i32_1 = arith.constant 0 : i32
    return %c0_i32, %c0_i32_0 : i32, i32
  }
  func.func @transform_4(%arg0: i32) -> (i32, i32) {
    %c0_i32 = arith.constant 0 : i32
    %c0_i32_0 = arith.constant 0 : i32
    %c0_i32_1 = arith.constant 0 : i32
    return %c0_i32, %c0_i32_0 : i32, i32
  }
  func.func @transform_5(%arg0: i32) -> (i32, i32) {
    %c0_i32 = arith.constant 0 : i32
    %c0_i32_0 = arith.constant 0 : i32
    %c0_i32_1 = arith.constant 0 : i32
    return %c0_i32, %c0_i32_0 : i32, i32
  }
  func.func @transform_6(%arg0: i32) -> (i32, i32) {
    %c0_i32 = arith.constant 0 : i32
    %c0_i32_0 = arith.constant 0 : i32
    %c0_i32_1 = arith.constant 0 : i32
    return %c0_i32, %c0_i32_0 : i32, i32
  }
  func.func @transform_7(%arg0: i32) -> (i32, i32) {
    %c0_i32 = arith.constant 0 : i32
    %c0_i32_0 = arith.constant 0 : i32
    return %arg0, %c0_i32 : i32, i32
  }
}

</mosaic_0001>

<bundles_post_ra>
// kernel: tpu_custom_call.1
= control target key start
LH: loop header
LB: loop body
LE: loop exit
PB: predicated region body
PF: predicated region fallthrough
CT: control target
= control target key end

     0   :  { %12 = vsyncpa [#allocation3], 0  ;;  %s1616_s0 = inlined_call_operand.hbm [shape: f32[24,128], index: 0, kind: input, shape index: {}]   ;;  %s1617_s1 = inlined_call_operand.hbm [shape: f32[128,128], index: 1, kind: input, shape index: {}]   ;;  %s1618_s2 = inlined_call_operand.vmem [shape: f32[1,128], index: 2, kind: input, shape index: {}]   ;;  %s1619_s3 = inlined_call_operand.hbm [shape: f32[128,128], index: 3, kind: input, shape index: {}]   ;;  %s1620_s4 = inlined_call_operand.vmem [shape: f32[1,128], index: 4, kind: input, shape index: {}]   ;;  %s1621_s5 = inlined_call_operand.hbm [shape: f32[128,128], index: 5, kind: input, shape index: {}]   ;;  %s1622_s6 = inlined_call_operand.vmem [shape: f32[1,128], index: 6, kind: input, shape index: {}]   ;;  %s1623_s7 = inlined_call_operand.hbm [shape: f32[24,128], index: 7, kind: output, shape index: {}]  }
   0x1   :  { %14 = vsyncpa [#allocation3 + $0x1], 0 }
   0x2   :  { %15 = vsyncpa [#allocation6], 0 }
   0x3   :  { %16 = vsyncpa [#allocation9], 0 }
   0x4   :  { %17 = vsyncpa [#allocation4], 0 }
   0x5   :  { %19 = vsyncpa [#allocation4 + $0x1], 0  ;;  %s1309_s24 = smov 0   ;;  %s1311_s25 = smov 0  }
   0x6   :  { %s1313_s26 = smov 0   ;;  %s1315_s27 = smov 0  }
   0x7 LB: > { %s1330_s28 = sadd.s32 4294967295, %s1257_s27   ;;  %s734_s29 = sadd.s32 4294967294, %s1257_s27   ;;  %s1257_s27 = sphi %s1315_s27, %s1648_s27   ;;  %s1253_s26 = sphi %s1313_s26, %s1647_s26   ;;  %s1249_s25 = sphi %s1311_s25, %s1646_s25   ;;  %s1245_s24 = sphi %s1309_s24, %s1645_s24  }
   0x8   : > { %p45_p0 = scmp.ne.s32.totalorder %s1249_s25, %s1245_s24  ;;  %p1624_p1 = scmp.eq.s32.totalorder %s1330_s28, 0 }
   0x9   : > { %p201_p3 = scmp.eq.s32.totalorder %s734_s29, 2  ;;  %p735_p5 = scmp.ge.s32.totalorder %s1257_s27, 1 }
   0xa   : > { %p1339_p4 = por %p1624_p1, %p45_p0  ;;  %p208_p7 = scmp.lt.s32.totalorder %s1257_s27, 4 }
   0xb   : > { %p1344_p6 = por %p201_p3, %p45_p0  ;;  %s1259_s10 = smov [#allocation5]  }
   0xc   : > { %s1628_s30 = scalar_select %p1339_p4, 1, 0 }
   0xd   : > { %s1629_s8 = scalar_select %p1344_p6, 1, 0 }
   0xe   : > { %p1349_p8 = pnand %p735_p5, %p208_p7  ;;  %s220_s11 = sshll.u32 %s1259_s10, 4  ;;  %s1353_s11 = int_to_ptr.vmem [resolvable:$true] %s220_s11 }
   0xf   : > { %1630 = sst [smem:[#allocation15_spill]] %s1629_s8  ;;  %s1260_s13 = smov [#allocation7]  }
  0x10   : > { %s1631_s9 = scalar_select %p1349_p8, 1, 0 }
  0x11   : > { %p999_p9 = pneg %p1349_p8  ;;  %s236_s14 = sshll.u32 %s1260_s13, 4  ;;  %s1363_s14 = int_to_ptr.vmem [resolvable:$true] %s236_s14 }
  0x12   : > { %s1261_s15 = smov [#allocation8]   ;;  %s1069_s19 = scalar_lea.hbm %s1617_s1, 2048 }
  0x13   : > { %p1359_p10 = pnand %p999_p9, %p1624_p1  ;;  %s1365_s16 = sshll.u32 %s1261_s15, 4  ;;  %s253_s16 = int_to_ptr.vmem [resolvable:$true] %s1365_s16 }
  0x14   : > { %p1070_p11 = scmp.ne.s32.totalorder %s1617_s1, %s1069_s19  ;;  %p1076_p3 = scmp.lt.u32.totalorder %s1069_s19, %s1617_s1 }
  0x15   : > { %p1375_p12 = pneg %p1359_p10 }
  0x17   : > { %p1072_p13 = pnand %p1375_p12, %p1070_p11 }
  0x19   : > { %p1073_p0 = pneg %p1072_p13 }
  0x1b   : > { %p1078_p5 = pnand %p1076_p3, %p1073_p0 }
  0x1d   : > { %1081 = shalt.err (!%p1078_p5)
}
  0x1e   : > { %s1082_s10 = scalar_lea.vmem %s1353_s11, 2048  ;;  %p1090_p2 = scmp.lt.s32.totalorder %s1353_s11, %s1353_s11 }
  0x1f   : > { %p1083_p7 = scmp.ne.s32.totalorder %s1353_s11, %s1082_s10  ;;  %p1091_p6 = scmp.lt.s32.totalorder %s1082_s10, %s1082_s10 }
  0x21   : > { %p1085_p9 = pnand %p1083_p7, %p1375_p12  ;;  %p1092_p11 = por %p1091_p6, %p1090_p2 }
  0x23   : > { %p1086_p1 = pneg %p1085_p9 }
  0x25   : > { %p1093_p13 = pnand %p1092_p11, %p1086_p1 }
  0x27   : > { %1096 = shalt.err (!%p1093_p13)
}
  0x28   : > { %s1262_s13 = smov 128   ;;  %s1263_s15 = smov 8  }
  0x29   : > { %1002 = dma.hbm_to_vmem [thread:$0]  (!%p1359_p10), %s1617_s1, 2048, %s1353_s11, [#allocation6], %s1262_s13, %s1262_s13, %s1263_s15  }
  0x2a   : > { %s1097_s21 = scalar_lea.hbm %s1619_s3, 2048 }
  0x2b   : > { %p1098_p1 = scmp.ne.s32.totalorder %s1619_s3, %s1097_s21  ;;  %p1104_p0 = scmp.lt.u32.totalorder %s1097_s21, %s1619_s3 }
  0x2d   : > { %p1100_p2 = pnand %p1098_p1, %p1375_p12 }
  0x2f   : > { %p1101_p6 = pneg %p1100_p2 }
  0x31   : > { %p1106_p3 = pnand %p1104_p0, %p1101_p6 }
  0x33   : > { %1109 = shalt.err (!%p1106_p3)
}
  0x34   : > { %s1110_s11 = scalar_lea.vmem %s1363_s14, 2048  ;;  %p1118_p11 = scmp.lt.s32.totalorder %s1363_s14, %s1363_s14 }
  0x35   : > { %p1111_p5 = scmp.ne.s32.totalorder %s1363_s14, %s1110_s11  ;;  %p1119_p13 = scmp.lt.s32.totalorder %s1110_s11, %s1110_s11 }
  0x37   : > { %p1113_p7 = pnand %p1111_p5, %p1375_p12  ;;  %p1120_p1 = por %p1119_p13, %p1118_p11 }
  0x39   : > { %p1114_p9 = pneg %p1113_p7 }
  0x3b   : > { %p1121_p2 = pnand %p1120_p1, %p1114_p9 }
  0x3d   : > { %1124 = shalt.err (!%p1121_p2)
}
  0x3e   : > { %1005 = dma.hbm_to_vmem [thread:$0]  (!%p1359_p10), %s1619_s3, 2048, %s1363_s14, [#allocation6], %s1262_s13, %s1262_s13, %s1263_s15  }
  0x3f   : > { %s1125_s20 = scalar_lea.hbm %s1621_s5, 2048 }
  0x40   : > { %p1126_p6 = scmp.ne.s32.totalorder %s1621_s5, %s1125_s20  ;;  %p1132_p5 = scmp.lt.u32.totalorder %s1125_s20, %s1621_s5 }
  0x42   : > { %p1128_p0 = pnand %p1126_p6, %p1375_p12 }
  0x44   : > { %p1129_p3 = pneg %p1128_p0 }
  0x46   : > { %p1134_p7 = pnand %p1132_p5, %p1129_p3 }
  0x48   : > { %1137 = shalt.err (!%p1134_p7)
}
  0x49   : > { %s1138_s11 = scalar_lea.vmem %s253_s16, 2048  ;;  %p1146_p1 = scmp.lt.s32.totalorder %s253_s16, %s253_s16 }
  0x4a   : > { %p1139_p9 = scmp.ne.s32.totalorder %s253_s16, %s1138_s11  ;;  %p1147_p2 = scmp.lt.s32.totalorder %s1138_s11, %s1138_s11 }
  0x4c   : > { %p1141_p11 = pnand %p1139_p9, %p1375_p12  ;;  %p1148_p4 = por %p1147_p2, %p1146_p1 }
  0x4e   : > { %p1142_p13 = pneg %p1141_p11 }
  0x50   : > { %p1149_p8 = pnand %p1148_p4, %p1142_p13 }
  0x52   : > { %1152 = shalt.err (!%p1149_p8)
}
  0x53   : > { %1008 = dma.hbm_to_vmem [thread:$0]  (!%p1359_p10), %s1621_s5, 2048, %s253_s16, [#allocation9], %s1262_s13, %s1262_s13, %s1263_s15  }
  0x54   : > { %s1448_s22 = sadd.s32 1, %s1257_s27   ;;  %s32_s17 = sadd.s32 1, %s1253_s26 }
  0x55   : > { %s29_s12 = ssub.s32 %s1257_s27, %s1448_s22  ;;  %p39_p8 = scmp.ne.s32.totalorder %s1253_s26, %s1249_s25 }
  0x56   : > { %p30_p4 = scmp.eq.s32.totalorder %s29_s12, 0  ;;  %p40_p12 = scmp.eq.s32.totalorder %s1257_s27, 0 }
  0x57   : > { %p1020_p6 = scmp.lt.s32.totalorder %s1257_s27, 3  ;;  %p1634_p3 = scmp.eq.s32.totalorder %s1330_s28, 2 }
  0x58   : > { %s1458_s18 = scalar_select %p30_p4, %s1253_s26, %s32_s17  }
  0x59   : > { %p41_p0 = por %p40_p12, %p39_p8  ;;  %p1462_p5 = por %p1634_p3, %p39_p8 }
  0x5a   : > { %s269_s20 = sand.u32 1, %s1253_s26   ;;  %s741_s21 = sshll.u32 %s1257_s27, 7 }
  0x5b   : > { %s740_s16 = sshll.u32 %s269_s20, 3  ;;  %s1471_s23 = scalar_lea.hbm %s1616_s0, %s741_s21 }
  0x5c   : > { %s273_s29 = scalar_lea.vmem [#allocation2], %s740_s16  ;;  %p1473_p10 = pnand %p1020_p6, %p41_p0 }
  0x5d   : > { %s280_s10 = sshll.u32 %s273_s29, 4  ;;  %s270_s14 = scalar_lea.sflag [#allocation3], %s269_s20  ;;  %s1477_s10 = int_to_ptr.vmem [resolvable:$true] %s280_s10 }
  0x5e   : > { %s1153_s8 = scalar_lea.hbm %s1471_s23, 128  ;;  %p1155_p9 = pneg %p1473_p10 }
  0x5f   : > { %p1154_p7 = scmp.ne.s32.totalorder %s1471_s23, %s1153_s8  ;;  %s1158_s21 = scalar_lea.hbm %s1616_s0, 384 }
  0x60   : > { %p1159_p1 = scmp.lt.u32.totalorder %s1471_s23, %s1616_s0  ;;  %p1160_p2 = scmp.lt.u32.totalorder %s1158_s21, %s1153_s8 }
  0x61   : > { %p1156_p11 = pnand %p1155_p9, %p1154_p7  ;;  %p1162_p8 = scmp.lt.u32.totalorder %s1153_s8, %s1471_s23 }
  0x62   : > { %p1161_p4 = por %p1160_p2, %p1159_p1 }
  0x63   : > { %p1157_p13 = pneg %p1156_p11 }
  0x64   : > { %p1163_p12 = por %p1162_p8, %p1161_p4 }
  0x66   : > { %p1164_p6 = pnand %p1163_p12, %p1157_p13 }
  0x68   : > { %1167 = shalt.err (!%p1164_p6)
}
  0x69   : > { %s1168_s20 = scalar_lea.vmem %s1477_s10, 128  ;;  %s1264_s15 = smov [#allocation2]  }
  0x6a   : > { %p1169_p0 = scmp.ne.s32.totalorder %s1477_s10, %s1168_s20  ;;  %s1173_s29 = sshll.u32 %s1264_s15, 4  ;;  %s1174_s29 = int_to_ptr.vmem [resolvable:$false] %s1173_s29 }
  0x6b   : > { %s1175_s12 = scalar_lea.vmem %s1174_s29, 256  ;;  %p1176_p11 = scmp.lt.s32.totalorder %s1477_s10, %s1174_s29 }
  0x6c   : > { %p1171_p3 = pnand %p1169_p0, %p1155_p9  ;;  %p1177_p1 = scmp.lt.s32.totalorder %s1175_s12, %s1168_s20 }
  0x6e   : > { %p1172_p7 = pneg %p1171_p3  ;;  %p1178_p2 = por %p1177_p1, %p1176_p11 }
  0x70   : > { %p1179_p4 = pnand %p1178_p2, %p1172_p7 }
  0x72   : > { %1182 = shalt.err (!%p1179_p4)
}
  0x73   : > { %1012 = dma.hbm_to_vmem [thread:$0]  (!%p1473_p10), %s1471_s23, 128, %s1477_s10, %s270_s14  }
  0x74   : > { %p1637_p13 = scmp.ne.s32.totalorder %s1631_s9, 0 }
  0x75   : > { %s1507_s8 = sand.u32 (!%p1637_p13), 1, %s1249_s25   ;;  %p1638_p9 = scmp.ne.s32.totalorder (!%p1637_p13), %s1628_s30, 0 }
  0x76   : > { %289 = sbr.rel (%p1637_p13) target bundleno = 846 (0x34e), region = 48  ;;  %s743_s17 = sshll.u32 (!%p1637_p13), %s1507_s8, 3 }
  0x77   : > { %s292_s21 = scalar_lea.sflag (!%p1637_p13), [#allocation3], %s1507_s8  ;;  %s1513_s16 = scalar_lea.vmem (!%p1637_p13), [#allocation2], %s743_s17 }
  0x7d   : > { %1228 = dma.done.wait (%p1638_p9), %s292_s21, 128  }
  0x7e   : > { %1230 = vsyncadd (%p1638_p9), %s292_s21, 4294967168  ;;  %p1639_p10 = scmp.eq.s32.totalorder %s1330_s28, 0 }
  0x80   : > { %1232 = dma.done.wait (%p1639_p10), [#allocation6], 4096   ;;  %p1640_p8 = pmov %p1639_p10 }
  0x82   : > { %1234 = vsyncadd (%p1640_p8), [#allocation6], 4294963200  ;;  %p1641_p12 = pmov %p1640_p8 }
  0x83   : > { %p1642_p6 = pmov %p1640_p8 }
  0x84   : > { %1236 = dma.done.wait (%p1641_p12), [#allocation9], 2048  }
  0x85   : > { %1238 = vsyncadd (%p1642_p6), [#allocation9], 4294965248  ;;  %v1265_v0 = vmov 0.0|0.0   ;;  %vm1266_vm0 = vmmov 0   ;;  %v1267_v1 = vmov 0.0   ;;  %v339_v2 = vld [vmem:[#allocation5] sm:$0xff] }
  0x86   : > { %911 = vmatprep.subr.bf16.mxu0 %v1265_v0  ;;  %838 = vmatprep.mubr.msk.f32.mxu0 %vm1266_vm0, %v1267_v1  ;;  %v340_v3 = vld [vmem:[#allocation5 + $0x8] sm:$0xff]  ;;  %v341_v4 = vld [vmem:[#allocation5 + $0x10] sm:$0xff]  ;;  %v342_v6 = vld [vmem:[#allocation5 + $0x18] sm:$0xff]  ;;  %s752_s13 = sshll.u32 %s1330_s28, 7  ;;  %s337_s20 = scalar_lea.vmem [#allocation10], %s743_s17 }
  0x87   : > { %935 = vmatprep.subr.bf16.mxu1 %v1265_v0  ;;  %873 = vmatprep.mubr.msk.f32.mxu1 %vm1266_vm0, %v1267_v1  ;;  %v912_v5 = vpack.c.bf16 %v340_v3, %v339_v2  ;;  %v915_v7 = vpack.c.bf16 %v342_v6, %v341_v4  ;;  %v343_v8 = vld [vmem:[#allocation5 + $0x20] sm:$0xff]  ;;  %v344_v9 = vld [vmem:[#allocation5 + $0x28] sm:$0xff]  ;;  %v435_v12 = vld [vmem:[#allocation7 + $0x10] sm:$0xff]  ;;  %s635_s15 = sshll.u32 %s337_s20, 4  ;;  %s1573_s21 = scalar_lea.hbm %s1623_s7, %s752_s13  ;;  %s1575_s15 = int_to_ptr.vmem [resolvable:$true] %s635_s15 }
  0x88   : > { %v433_v10 = vld [vmem:[#allocation7] sm:$0xff]  ;;  %v434_v11 = vld [vmem:[#allocation7 + $0x8] sm:$0xff]  ;;  %v436_v13 = vld [vmem:[#allocation7 + $0x18] sm:$0xff]  ;;  %v918_v14 = vpack.c.bf16 %v344_v9, %v343_v8  ;;  %s1183_s30 = scalar_lea.vmem %s1575_s15, 128  ;;  %s1268_s28 = smov [#allocation10]  }
  0x89   : > { %913 = vmatpush3.bf16.msra.mxu0 %v912_v5  ;;  %v936_v15 = vpack.c.bf16 %v434_v11, %v433_v10  ;;  %v345_v16 = vld [vmem:[#allocation5 + $0x30] sm:$0xff]  ;;  %v346_v17 = vld [vmem:[#allocation5 + $0x38] sm:$0xff]  ;;  %v939_v18 = vpack.c.bf16 %v436_v13, %v435_v12  ;;  %v437_v19 = vld [vmem:[#allocation7 + $0x20] sm:$0xff]  ;;  %p1184_p0 = scmp.ne.s32.totalorder %s1575_s15, %s1183_s30  ;;  %s1187_s17 = sshll.u32 %s1268_s28, 4  ;;  %s1188_s17 = int_to_ptr.vmem [resolvable:$false] %s1187_s17 }
  0x8a   : > { %914 = vmatprep.subr.bf16.mxu0 %v1265_v0  ;;  %v438_v20 = vld [vmem:[#allocation7 + $0x28] sm:$0xff]  ;;  %v921_v21 = vpack.c.bf16 %v346_v17, %v345_v16  ;;  %v347_v22 = vld [vmem:[#allocation5 + $0x40] sm:$0xff]  ;;  %v439_v25 = vld [vmem:[#allocation7 + $0x30] sm:$0xff]  ;;  %s1189_s9 = scalar_lea.vmem %s1188_s17, 256  ;;  %p1190_p11 = scmp.lt.s32.totalorder %s1575_s15, %s1188_s17 }
  0x8b   : > { %937 = vmatpush3.bf16.msra.mxu1 %v936_v15  ;;  %v348_v23 = vld [vmem:[#allocation5 + $0x48] sm:$0xff]  ;;  %v942_v24 = vpack.c.bf16 %v438_v20, %v437_v19  ;;  %v440_v26 = vld [vmem:[#allocation7 + $0x38] sm:$0xff]  ;;  %v349_v28 = vld [vmem:[#allocation5 + $0x50] sm:$0xff]  ;;  %p1185_p3 = pnand %p1184_p0, %p1462_p5  ;;  %p1191_p1 = scmp.lt.s32.totalorder %s1189_s9, %s1183_s30 }
  0x8c   : > { %938 = vmatprep.subr.bf16.mxu1 %v1265_v0  ;;  %v924_v27 = vpack.c.bf16 %v348_v23, %v347_v22  ;;  %v350_v29 = vld [vmem:[#allocation5 + $0x58] sm:$0xff]  ;;  %v945_v30 = vpack.c.bf16 %v440_v26, %v439_v25  ;;  %v441_v31 = vld [vmem:[#allocation7 + $0x40] sm:$0xff]  ;;  %v442_v32 = vld [vmem:[#allocation7 + $0x48] sm:$0xff] }
  0x8d   : > { %916 = vmatpush3.bf16.msra.mxu0 %v915_v7  ;;  %v927_v33 = vpack.c.bf16 %v350_v29, %v349_v28  ;;  %v351_v34 = vld [vmem:[#allocation5 + $0x60] sm:$0xff]  ;;  %v352_v35 = vld [vmem:[#allocation5 + $0x68] sm:$0xff]  ;;  %v948_v36 = vpack.c.bf16 %v442_v32, %v441_v31  ;;  %v353_v38 = vld [vmem:[#allocation5 + $0x70] sm:$0xff]  ;;  %p1186_p7 = pneg %p1185_p3  ;;  %p1192_p2 = por %p1191_p1, %p1190_p11 }
  0x8e   : > { %917 = vmatprep.subr.bf16.mxu0 %v1265_v0  ;;  %v930_v37 = vpack.c.bf16 %v352_v35, %v351_v34  ;;  %v354_v39 = vld [vmem:[#allocation5 + $0x78] sm:$0xff]  ;;  %v443_v42 = vld [vmem:[#allocation7 + $0x50] sm:$0xff]  ;;  %v445_v45 = vld [vmem:[#allocation7 + $0x60] sm:$0xff] }
  0x8f   : > { %940 = vmatpush3.bf16.msra.mxu1 %v939_v18  ;;  %v933_v40 = vpack.c.bf16 %v354_v39, %v353_v38  ;;  %v338_v41 = vld [vmem:[%s1513_s16] sm:$0xff]  ;;  %v446_v46 = vld [vmem:[#allocation7 + $0x68] sm:$0xff]  ;;  %v527_v51 = vld [vmem:[#allocation8] sm:$0xff]  ;;  %s622_s16 = scalar_lea.sflag [#allocation4], %s1507_s8  ;;  %p1193_p4 = pnand %p1192_p2, %p1186_p7 }
  0x90   : > { %941 = vmatprep.subr.bf16.mxu1 %v1265_v0  ;;  %v444_v43 = vld [vmem:[#allocation7 + $0x58] sm:$0xff]  ;;  %v954_v47 = vpack.c.bf16 %v446_v46, %v445_v45  ;;  %v447_v48 = vld [vmem:[#allocation7 + $0x70] sm:$0xff]  ;;  %v528_v52 = vld [vmem:[#allocation8 + $0x8] sm:$0xff] }
  0x91   : > { %919 = vmatpush3.bf16.msra.mxu0 %v918_v14  ;;  %v951_v44 = vpack.c.bf16 %v444_v43, %v443_v42  ;;  %v448_v49 = vld [vmem:[#allocation7 + $0x78] sm:$0xff]  ;;  %v529_v53 = vld [vmem:[#allocation8 + $0x10] sm:$0xff]  ;;  %v960_v54 = vpack.c.bf16 %v528_v52, %v527_v51  ;;  %v531_v57 = vld [vmem:[#allocation8 + $0x20] sm:$0xff] }
  0x92   : > { %920 = vmatprep.subr.bf16.mxu0 %v1265_v0  ;;  %v957_v50 = vpack.c.bf16 %v448_v49, %v447_v48  ;;  %v530_v55 = vld [vmem:[#allocation8 + $0x18] sm:$0xff]  ;;  %v532_v58 = vld [vmem:[#allocation8 + $0x28] sm:$0xff]  ;;  %v533_v60 = vld [vmem:[#allocation8 + $0x30] sm:$0xff] }
  0x93   : > { %943 = vmatpush3.bf16.msra.mxu1 %v942_v24  ;;  %v963_v56 = vpack.c.bf16 %v530_v55, %v529_v53  ;;  %v966_v59 = vpack.c.bf16 %v532_v58, %v531_v57  ;;  %v534_v61 = vld [vmem:[#allocation8 + $0x38] sm:$0xff]  ;;  %v535_v63 = vld [vmem:[#allocation8 + $0x40] sm:$0xff]  ;;  %v748_v3 = vld [vmem:[%s1618_s2] ss:$0 sm:$0xff] }
  0x94   : > { %944 = vmatprep.subr.bf16.mxu1 %v1265_v0  ;;  %v969_v62 = vpack.c.bf16 %v534_v61, %v533_v60  ;;  %v537_v8 = vld [vmem:[#allocation8 + $0x50] sm:$0xff]  ;;  %v538_v9 = vld [vmem:[#allocation8 + $0x58] sm:$0xff]  ;;  %v539_v11 = vld [vmem:[#allocation8 + $0x60] sm:$0xff] }
  0x95   : > { %922 = vmatpush3.bf16.msra.mxu0 %v921_v21  ;;  %v975_v10 = vpack.c.bf16 %v538_v9, %v537_v8  ;;  %v540_v12 = vld [vmem:[#allocation8 + $0x68] sm:$0xff]  ;;  %v541_v14 = vld [vmem:[#allocation8 + $0x70] sm:$0xff]  ;;  %v542_v15 = vld [vmem:[#allocation8 + $0x78] sm:$0xff] }
  0x96   : > { %923 = vmatprep.subr.bf16.mxu0 %v1265_v0  ;;  %v978_v13 = vpack.c.bf16 %v540_v12, %v539_v11  ;;  %v981_v16 = vpack.c.bf16 %v542_v15, %v541_v14  ;;  %v749_v17 = vld [vmem:[%s1620_s4] ss:$0 sm:$0xff] }
  0x97   : > { %946 = vmatpush3.bf16.msra.mxu1 %v945_v30  ;;  %v750_v22 = vld [vmem:[%s1622_s6] ss:$0 sm:$0xff] }
  0x98   : > { %947 = vmatprep.subr.bf16.mxu1 %v1265_v0 }
  0x99   : > { %925 = vmatpush3.bf16.msra.mxu0 %v924_v27 }
  0x9a   : > { %926 = vmatprep.subr.bf16.mxu0 %v1265_v0 }
  0x9b   : > { %949 = vmatpush3.bf16.msra.mxu1 %v948_v36 }
  0x9c   : > { %950 = vmatprep.subr.bf16.mxu1 %v1265_v0 }
  0x9d   : > { %928 = vmatpush3.bf16.msra.mxu0 %v927_v33 }
  0x9e   : > { %929 = vmatprep.subr.bf16.mxu0 %v1265_v0 }
  0x9f   : > { %952 = vmatpush3.bf16.msra.mxu1 %v951_v44 }
  0xa0   : > { %953 = vmatprep.subr.bf16.mxu1 %v1265_v0 }
  0xa1   : > { %931 = vmatpush3.bf16.msra.mxu0 %v930_v37 }
  0xa2   : > { %932 = vmatprep.subr.bf16.mxu0 %v1265_v0 }
  0xa3   : > { %955 = vmatpush3.bf16.msra.mxu1 %v954_v47 }
  0xa4   : > { %956 = vmatprep.subr.bf16.mxu1 %v1265_v0 }
  0xa5   : > { %934 = vmatpush3.bf16.msra.mxu0 %v933_v40 }
  0xa6   : > { %959 = vmatprep.subr.bf16.mxu0 %v1265_v0 }
  0xa7   : > { %958 = vmatpush3.bf16.msra.mxu1 %v957_v50 }
  0xa8   : > { %839 = vmatmul.mubr.f32.vlgmr.msra.gmra.mrb[0].mxu0 %v338_v41 }
  0xa9   : > { %908 = vmatprep.mubr.msk.f32.mxu0 %vm1266_vm0, %v1267_v1  ;;  %961 = vmatpush3.bf16.msra.mxu0 %v960_v54  ;;  %v536_v1 = vld [vmem:[#allocation8 + $0x48] sm:$0xff] }
  0xaa   : > { %962 = vmatprep.subr.bf16.mxu0 %v1265_v0  ;;  %v972_v2 = vpack.c.bf16 %v536_v1, %v535_v63 }
  0xad   : > { %964 = vmatpush3.bf16.msra.mxu0 %v963_v56 }
  0xae   : > { %965 = vmatprep.subr.bf16.mxu0 %v1265_v0 }
  0xb1   : > { %967 = vmatpush3.bf16.msra.mxu0 %v966_v59 }
  0xb2   : > { %968 = vmatprep.subr.bf16.mxu0 %v1265_v0 }
  0xb5   : > { %970 = vmatpush3.bf16.msra.mxu0 %v969_v62 }
  0xb6   : > { %971 = vmatprep.subr.bf16.mxu0 %v1265_v0 }
  0xb9   : > { %973 = vmatpush3.bf16.msra.mxu0 %v972_v2 }
  0xba   : > { %974 = vmatprep.subr.bf16.mxu0 %v1265_v0 }
  0xbd   : > { %976 = vmatpush3.bf16.msra.mxu0 %v975_v10 }
  0xbe   : > { %977 = vmatprep.subr.bf16.mxu0 %v1265_v0 }
  0xc1   : > { %979 = vmatpush3.bf16.msra.mxu0 %v978_v13 }
  0xc2   : > { %980 = vmatprep.subr.bf16.mxu0 %v1265_v0 }
  0xc5   : > { %982 = vmatpush3.bf16.msra.mxu0 %v981_v16 }
 0x17b   : > { %v428_v4 = vpop.f32.mrb[0].mxu0 }
 0x17c   : > { %v429_v5 = vadd.f32 %v748_v3, %v428_v4  ;;  %v840_v6 = vpop.f32.mrb[1].mxu0 }
 0x17e   : > { %1065 = vtanh.f32 %v429_v5 }
 0x188   : > { %v1066_v7 = vpop.eup %1065 }
 0x189   : > { %874 = vmatmul.mubr.f32.vlgmr.msra.gmra.mrb[0].mxu1 %v1066_v7 }
 0x25c   : > { %v522_v18 = vpop.f32.mrb[0].mxu1 }
 0x25d   : > { %v523_v19 = vadd.f32 %v749_v17, %v522_v18  ;;  %v875_v20 = vpop.f32.mrb[1].mxu1 }
 0x25f   : > { %1067 = vtanh.f32 %v523_v19 }
 0x269   : > { %v1068_v21 = vpop.eup %1067 }
 0x26a   : > { %909 = vmatmul.mubr.f32.vlgmr.msra.gmra.mrb[2].mxu0 %v1068_v21 }
 0x33d   : > { %v616_v0 = vpop.f32.mrb[2].mxu0 }
 0x33e   : > { %v617_v23 = vadd.f32 %v750_v22, %v616_v0  ;;  %v910_v24 = vpop.f32.mrb[3].mxu0 }
 0x340   : > { %620 = vst [vmem:[%s337_s20] sm:$0xff] %v617_v23 }
 0x341   : > { %1196 = shalt.err (!%p1193_p4)
}
 0x342   : > { %s1197_s8 = scalar_lea.hbm %s1573_s21, 128  ;;  %s1201_s11 = scalar_lea.hbm %s1623_s7, 384 }
 0x343   : > { %p1198_p13 = scmp.ne.s32.totalorder %s1573_s21, %s1197_s8  ;;  %p1202_p8 = scmp.lt.u32.totalorder %s1573_s21, %s1623_s7 }
 0x344   : > { %p1203_p12 = scmp.lt.u32.totalorder %s1201_s11, %s1197_s8  ;;  %p1205_p0 = scmp.lt.u32.totalorder %s1197_s8, %s1573_s21 }
 0x345   : > { %p1199_p9 = pnand %p1198_p13, %p1462_p5 }
 0x346   : > { %p1204_p6 = por %p1203_p12, %p1202_p8 }
 0x347   : > { %p1200_p10 = pneg %p1199_p9 }
 0x348   : > { %p1206_p3 = por %p1205_p0, %p1204_p6 }
 0x34a   : > { %p1207_p7 = pnand %p1206_p3, %p1200_p10 }
 0x34c   : > { %1210 = shalt.err (!%p1207_p7)
}
 0x34d   : > { %997 = dma.vmem_to_hbm [thread:$0]  (%p1462_p5), %s1575_s15, 128, %s1573_s21, %s622_s16  }
 0x34e PF: > { %s1643_s20 = sld [smem:[#allocation15_spill]]  ;;  %p1024_p11 = scmp.ge.s32.totalorder %s1257_s27, 2 }
 0x34f   : > { %s647_s29 = sand.u32 1, %s1245_s24  }
 0x350   : > { %s648_s12 = scalar_lea.sflag [#allocation4], %s647_s29 }
 0x354   : > { %p1644_p1 = scmp.ne.s32.totalorder %s1643_s20, 0 }
 0x356   : > { %p1014_p2 = pnand %p1024_p11, %p1644_p1 }
 0x358   : > { %1240 = dma.done.wait (!%p1014_p2), %s648_s12, 128  }
 0x359   : > { %1242 = vsyncadd (!%p1014_p2), %s648_s12, 4294967168  ;;  %p22_p4 = scmp.ge.s32.totalorder %s1448_s22, 5   ;;  %s1645_s24 = smov %s1249_s25 }
 0x35a   : > { %s1646_s25 = smov %s1253_s26  ;;  %s1647_s26 = smov %s1458_s18 }
 0x35b   : > { %s1648_s27 = smov %s1448_s22  ;;  %24 = sbr.rel (!%p22_p4) target bundleno = 7 (0x7), region = 105 }
 0x362   :  { %653 = vsyncpa [#allocation3], 1 }
 0x363   :  { %655 = vsyncpa [#allocation3 + $0x1], 1 }
 0x364   :  { %656 = vsyncpa [#allocation6], 1 }
 0x365   :  { %657 = vsyncpa [#allocation9], 1 }
 0x366   :  { %658 = vsyncpa [#allocation4], 1 }
 0x367   :  { %660 = vsyncpa [#allocation4 + $0x1], 1 }

</bundles_post_ra>
